<compile_context>
chip_gen: v7x
topology: tpu7x:2x2x1
jax: 0.10.0
libtpu: 0.0.40
codegen_flags: <defaults>
</compile_context>

<pallas_src>
import jax
import jax.numpy as jnp
from jax.experimental import pallas as pl
from jax.experimental.pallas import tpu as pltpu

IN_DIM = 768
HID_DIM = 300
NUM_CLASSES = 200          # len(CATEGORY_ID_LIST) — chosen deterministically in-script
HID_PAD = 384              # 300 -> 3*128 lanes (clean MXU / vreg layout)
OUT_PAD = 256              # 200 -> 2*128 lanes (unmasked lane-dense stores)
EPS = 1e-5
PAD_LOGIT = -1e30          # bias for padded classes -> argmax/softmax safe on padded output


def _head_kernel(x_ref, w1_ref, b1_ref, w2_ref, b2_ref, o_ref):
    # x: (tile, 768) f32 -> bf16 cast in VMEM; W1': (768, 384) bf16; W2: (384, 256) bf16;
    # biases f32; MXU accumulates in f32.
    x = x_ref[...].astype(jnp.bfloat16)
    h = jnp.dot(x, w1_ref[...], preferred_element_type=jnp.float32) + b1_ref[...]
    h = jnp.maximum(h, 0.0)                          # relu(BN2 folded into W1'/b1')
    out = jnp.dot(h.astype(jnp.bfloat16), w2_ref[...],
                  preferred_element_type=jnp.float32) + b2_ref[...]
    o_ref[...] = out.astype(o_ref.dtype)             # lane-dense (tile, 256) store


def _round_up(v, m):
    return ((v + m - 1) // m) * m


def _pick_tile(n, requested):
    """Batch tile: multiple of 16 (256 when large); >= 2 grid steps when the batch allows."""
    if n <= 256:
        return min(_round_up(max(n, 16), 16), _round_up(max(requested, 16), 16))
    half = _round_up(pl.cdiv(n, 2), 256)             # keep >= 2 steps (v7x megacore)
    return max(256, min(_round_up(requested, 256), half))


def classification_head(features, params, *, tile_n=2048, out_dtype=jnp.float32):
    """features: (N, 768) float32.  Returns (N, OUT_PAD) logits.

    Columns >= NUM_CLASSES hold ~-1e30 (never win an argmax); slice [:, :NUM_CLASSES]
    only if a consumer really needs the exact PyTorch shape (extra HBM pass).
    """
    n = features.shape[0]
    tile = _pick_tile(n, tile_n)
    grid = (pl.cdiv(n, tile),)

    const = lambda shape: pl.BlockSpec(shape, lambda i: (0, 0))
    out_bytes = jnp.dtype(out_dtype).itemsize
    cost = pl.CostEstimate(
        flops=2 * n * (IN_DIM * HID_PAD + HID_PAD * OUT_PAD),
        transcendentals=0,
        bytes_accessed=(n * IN_DIM * 4                      # f32 features in
                        + n * OUT_PAD * out_bytes           # logits out
                        + IN_DIM * HID_PAD * 2 + HID_PAD * OUT_PAD * 2   # bf16 weights
                        + (HID_PAD + OUT_PAD) * 4))         # f32 biases

    return pl.pallas_call(
        _head_kernel,
        out_shape=jax.ShapeDtypeStruct((n, OUT_PAD), out_dtype),
        grid=grid,
        in_specs=[
            pl.BlockSpec((tile, IN_DIM), lambda i: (i, 0)),  # x: streamed over batch
            const((IN_DIM, HID_PAD)),                        # W1' (resident)
            const((1, HID_PAD)),                             # b1' (resident)
            const((HID_PAD, OUT_PAD)),                       # W2  (resident)
            const((1, OUT_PAD)),                             # b2  (resident)
        ],
        out_specs=pl.BlockSpec((tile, OUT_PAD), lambda i: (i, 0)),
        compiler_params=pltpu.CompilerParams(
            dimension_semantics=("parallel",),               # megacore on v7x
            vmem_limit_bytes=48 * 1024 * 1024),              # <= ~48 MB (v7x has 64 MiB/TC)
        cost_estimate=cost,
    )(features, params["w1"], params["b1"], params["w2"], params["b2"])


def make_raw_params(key):
    """Raw module parameters (eval-mode BatchNorm running stats + Linear weights)."""
    ks = jax.random.split(key, 12)

    gamma1 = 1.0 + 0.1 * jax.random.normal(ks[0], (IN_DIM,), jnp.float32)
    beta1 = 0.1 * jax.random.normal(ks[1], (IN_DIM,), jnp.float32)
    mean1 = 0.05 * jax.random.normal(ks[2], (IN_DIM,), jnp.float32)
    var1 = 1.0 + 0.1 * jax.random.uniform(ks[3], (IN_DIM,), jnp.float32)

    # Linear(768, 300): stored as W^T (768, 300)
    w1 = jax.random.normal(ks[4], (IN_DIM, HID_DIM), jnp.float32) / jnp.sqrt(IN_DIM)
    bias1 = 0.01 * jax.random.normal(ks[5], (HID_DIM,), jnp.float32)

    gamma2 = 1.0 + 0.1 * jax.random.normal(ks[6], (HID_DIM,), jnp.float32)
    beta2 = 0.1 * jax.random.normal(ks[7], (HID_DIM,), jnp.float32)
    mean2 = 0.05 * jax.random.normal(ks[8], (HID_DIM,), jnp.float32)
    var2 = 1.0 + 0.1 * jax.random.uniform(ks[9], (HID_DIM,), jnp.float32)

    # Linear(300, NUM_CLASSES): stored as W^T (300, 200)
    w2 = jax.random.normal(ks[10], (HID_DIM, NUM_CLASSES), jnp.float32) / jnp.sqrt(HID_DIM)
    bias2 = 0.01 * jax.random.normal(ks[11], (NUM_CLASSES,), jnp.float32)

    return {"gamma1": gamma1, "beta1": beta1, "mean1": mean1, "var1": var1,
            "w1": w1, "bias1": bias1,
            "gamma2": gamma2, "beta2": beta2, "mean2": mean2, "var2": var2,
            "w2": w2, "bias2": bias2}


def fold_and_pad(raw):
    """Fold both BN affines into the first linear, zero/neg-pad to lane-friendly dims, cast."""
    a1 = raw["gamma1"] / jnp.sqrt(raw["var1"] + EPS)
    b1 = raw["beta1"] - a1 * raw["mean1"]
    a2 = raw["gamma2"] / jnp.sqrt(raw["var2"] + EPS)
    b2 = raw["beta2"] - a2 * raw["mean2"]

    w1f = (a1[:, None] * raw["w1"]) * a2[None, :]               # (768, 300)
    b1f = (b1 @ raw["w1"] + raw["bias1"]) * a2 + b2             # (300,)

    w1p = jnp.zeros((IN_DIM, HID_PAD), jnp.float32).at[:, :HID_DIM].set(w1f)
    b1p = jnp.zeros((1, HID_PAD), jnp.float32).at[0, :HID_DIM].set(b1f)
    w2p = jnp.zeros((HID_PAD, OUT_PAD), jnp.float32).at[:HID_DIM, :NUM_CLASSES].set(raw["w2"])
    # Padded classes get a huge negative bias -> safe to consume padded logits directly.
    b2p = jnp.full((1, OUT_PAD), PAD_LOGIT, jnp.float32).at[0, :NUM_CLASSES].set(raw["bias2"])

    return {"w1": w1p.astype(jnp.bfloat16), "b1": b1p,
            "w2": w2p.astype(jnp.bfloat16), "b2": b2p}


def reference(features, raw):
    """Pure-JAX f32 reference of the original eval-mode forward."""
    a1 = raw["gamma1"] / jnp.sqrt(raw["var1"] + EPS)
    b1 = raw["beta1"] - a1 * raw["mean1"]
    a2 = raw["gamma2"] / jnp.sqrt(raw["var2"] + EPS)
    b2 = raw["beta2"] - a2 * raw["mean2"]
    x = features * a1 + b1                                       # BatchNorm1d(768), eval
    h = jnp.dot(x, raw["w1"], precision=jax.lax.Precision.HIGHEST) + raw["bias1"]
    h = jnp.maximum(h * a2 + b2, 0.0)                            # relu(BatchNorm1d(300))
    return jnp.dot(h, raw["w2"], precision=jax.lax.Precision.HIGHEST) + raw["bias2"]


if __name__ == "__main__":
    key = jax.random.PRNGKey(0)
    kx, kp = jax.random.split(key)

    # Small demo batch: tile_n=16 -> 3 grid steps, last block partial (masked edge store).
    N = 40
    features = jax.random.normal(kx, (N, IN_DIM), jnp.float32)

    raw = make_raw_params(kp)
    params = fold_and_pad(raw)

    out = classification_head(features, params, tile_n=16)
    out = jax.block_until_ready(out)

    assert out.shape == (N, OUT_PAD)
    # Padded classes (200..255) must never win an argmax.
    assert bool(jnp.all(out[:, NUM_CLASSES:] < -1e29))

    logits = out[:, :NUM_CLASSES]          # test-only slice for the numeric comparison
    ref = reference(features, raw)
    # bf16 activations/weights with f32 accumulation -> ~0.5% relative error vs f32 ref
    assert jnp.allclose(logits, ref, atol=5e-2, rtol=5e-2), \
        float(jnp.max(jnp.abs(logits - ref)))

    print("KERNEL_OK")
</pallas_src>

<mosaic_0001>
module attributes {stable_mosaic.version = 11 : i64} {
  func.func @_head_kernel(%arg0: i32, %arg1: memref<16x768xf32, #tpu.memory_space<vmem>>, %arg2: memref<768x384xbf16, #tpu.memory_space<vmem>>, %arg3: memref<1x384xf32, #tpu.memory_space<vmem>>, %arg4: memref<384x256xbf16, #tpu.memory_space<vmem>>, %arg5: memref<1x256xf32, #tpu.memory_space<vmem>>, %arg6: memref<16x256xf32, #tpu.memory_space<vmem>>) attributes {dimension_semantics = [#tpu.dimension_semantics<parallel>], iteration_bounds = array<i64: 3>, scalar_prefetch = 0 : i64, scratch_operands = 0 : i64, tpu.core_type = #tpu.core_type<tc>, window_params = [{transform_indices = @transform_0, window_bounds = array<i64: 16, 768>}, {pipeline_mode = #tpu.pipeline_mode<synchronous>, transform_indices = @transform_1, window_bounds = array<i64: 768, 384>}, {pipeline_mode = #tpu.pipeline_mode<synchronous>, transform_indices = @transform_2, window_bounds = array<i64: 1, 384>}, {pipeline_mode = #tpu.pipeline_mode<synchronous>, transform_indices = @transform_3, window_bounds = array<i64: 384, 256>}, {pipeline_mode = #tpu.pipeline_mode<synchronous>, transform_indices = @transform_4, window_bounds = array<i64: 1, 256>}, {transform_indices = @transform_5, window_bounds = array<i64: 16, 256>}]} {
    %c0 = arith.constant 0 : index
    %c0_0 = arith.constant 0 : index
    %0 = vector.load %arg1[%c0, %c0_0] : memref<16x768xf32, #tpu.memory_space<vmem>>, vector<16x768xf32>
    %1 = arith.truncf %0 : vector<16x768xf32> to vector<16x768xbf16>
    %c0_1 = arith.constant 0 : index
    %c0_2 = arith.constant 0 : index
    %2 = vector.load %arg2[%c0_1, %c0_2] : memref<768x384xbf16, #tpu.memory_space<vmem>>, vector<768x384xbf16>
    %cst = arith.constant dense<0.000000e+00> : vector<16x384xf32>
    %3 = tpu.matmul %1, %2, %cst {dimension_numbers = #tpu.dot_dimension_numbers<[1], [0], [0], [1], [0, 0, 1, 1], [], []>} : vector<16x768xbf16>, vector<768x384xbf16>, vector<16x384xf32> -> vector<16x384xf32>
    %c0_3 = arith.constant 0 : index
    %c0_4 = arith.constant 0 : index
    %4 = vector.load %arg3[%c0_3, %c0_4] : memref<1x384xf32, #tpu.memory_space<vmem>>, vector<1x384xf32>
    %5 = vector.broadcast %4 : vector<1x384xf32> to vector<16x384xf32>
    %6 = arith.addf %3, %5 : vector<16x384xf32>
    %cst_5 = arith.constant 0.000000e+00 : f32
    %7 = vector.broadcast %cst_5 : f32 to vector<16x384xf32>
    %8 = arith.maximumf %6, %7 : vector<16x384xf32>
    %9 = arith.truncf %8 : vector<16x384xf32> to vector<16x384xbf16>
    %c0_6 = arith.constant 0 : index
    %c0_7 = arith.constant 0 : index
    %10 = vector.load %arg4[%c0_6, %c0_7] : memref<384x256xbf16, #tpu.memory_space<vmem>>, vector<384x256xbf16>
    %cst_8 = arith.constant dense<0.000000e+00> : vector<16x256xf32>
    %11 = tpu.matmul %9, %10, %cst_8 {dimension_numbers = #tpu.dot_dimension_numbers<[1], [0], [0], [1], [0, 0, 1, 1], [], []>} : vector<16x384xbf16>, vector<384x256xbf16>, vector<16x256xf32> -> vector<16x256xf32>
    %c0_9 = arith.constant 0 : index
    %c0_10 = arith.constant 0 : index
    %12 = vector.load %arg5[%c0_9, %c0_10] : memref<1x256xf32, #tpu.memory_space<vmem>>, vector<1x256xf32>
    %13 = vector.broadcast %12 : vector<1x256xf32> to vector<16x256xf32>
    %14 = arith.addf %11, %13 : vector<16x256xf32>
    %c0_11 = arith.constant 0 : index
    %c0_12 = arith.constant 0 : index
    %15 = vector.load %arg6[%c0_11, %c0_12] : memref<16x256xf32, #tpu.memory_space<vmem>>, vector<16x256xf32>
    tpu.vector_store %arg6[%c0_11, %c0_12], %14 {strides = array<i32>} : memref<16x256xf32, #tpu.memory_space<vmem>>, vector<16x256xf32>,
    return
  }
  func.func @transform_0(%arg0: i32) -> (i32, i32) {
    %c0_i32 = arith.constant 0 : i32
    %c0_i32_0 = arith.constant 0 : i32
    return %arg0, %c0_i32 : i32, i32
  }
  func.func @transform_1(%arg0: i32) -> (i32, i32) {
    %c0_i32 = arith.constant 0 : i32
    %c0_i32_0 = arith.constant 0 : i32
    %c0_i32_1 = arith.constant 0 : i32
    return %c0_i32, %c0_i32_0 : i32, i32
  }
  func.func @transform_2(%arg0: i32) -> (i32, i32) {
    %c0_i32 = arith.constant 0 : i32
    %c0_i32_0 = arith.constant 0 : i32
    %c0_i32_1 = arith.constant 0 : i32
    return %c0_i32, %c0_i32_0 : i32, i32
  }
  func.func @transform_3(%arg0: i32) -> (i32, i32) {
    %c0_i32 = arith.constant 0 : i32
    %c0_i32_0 = arith.constant 0 : i32
    %c0_i32_1 = arith.constant 0 : i32
    return %c0_i32, %c0_i32_0 : i32, i32
  }
  func.func @transform_4(%arg0: i32) -> (i32, i32) {
    %c0_i32 = arith.constant 0 : i32
    %c0_i32_0 = arith.constant 0 : i32
    %c0_i32_1 = arith.constant 0 : i32
    return %c0_i32, %c0_i32_0 : i32, i32
  }
  func.func @transform_5(%arg0: i32) -> (i32, i32) {
    %c0_i32 = arith.constant 0 : i32
    %c0_i32_0 = arith.constant 0 : i32
    return %arg0, %c0_i32 : i32, i32
  }
}

</mosaic_0001>

<bundles_post_ra>
// kernel: tpu_custom_call.1
= control target key start
LH: loop header
LB: loop body
LE: loop exit
PB: predicated region body
PF: predicated region fallthrough
CT: control target
= control target key end

     0   :  { %10 = vsyncpa [#allocation3], 0  ;;  %s3172_s0 = inlined_call_operand.hbm [shape: f32[40,768], index: 0, kind: input, shape index: {}]   ;;  %s3173_s1 = inlined_call_operand.hbm [shape: bf16[768,384], index: 1, kind: input, shape index: {}]   ;;  %s3174_s2 = inlined_call_operand.vmem [shape: f32[1,384], index: 2, kind: input, shape index: {}]   ;;  %s3175_s3 = inlined_call_operand.hbm [shape: bf16[384,256], index: 3, kind: input, shape index: {}]   ;;  %s3176_s4 = inlined_call_operand.vmem [shape: f32[1,256], index: 4, kind: input, shape index: {}]   ;;  %s3177_s5 = inlined_call_operand.hbm [shape: f32[40,256], index: 5, kind: output, shape index: {}]  }
   0x1   :  { %12 = vsyncpa [#allocation3 + $0x1], 0 }
   0x2   :  { %13 = vsyncpa [#allocation6], 0 }
   0x3   :  { %14 = vsyncpa [#allocation4], 0 }
   0x4   :  { %16 = vsyncpa [#allocation4 + $0x1], 0  ;;  %s2896_s18 = smov 0   ;;  %s2898_s19 = smov 0  }
   0x5   :  { %s2900_s20 = smov 0   ;;  %s2902_s21 = smov 0  }
   0x6 LB: > { %s2917_s22 = sadd.s32 4294967295, %s2851_s21   ;;  %s2053_s23 = sadd.s32 4294967294, %s2851_s21   ;;  %s2851_s21 = sphi %s2902_s21, %s3199_s21   ;;  %s2847_s20 = sphi %s2900_s20, %s3198_s20   ;;  %s2843_s19 = sphi %s2898_s19, %s3197_s19   ;;  %s2839_s18 = sphi %s2896_s18, %s3196_s18  }
   0x7   : > { %s2921_s24 = sadd.s32 1, %s2851_s21   ;;  %s29_s25 = sadd.s32 1, %s2847_s20 }
   0x8   : > { %s26_s26 = ssub.s32 %s2851_s21, %s2921_s24  ;;  %p36_p0 = scmp.ne.s32.totalorder %s2847_s20, %s2843_s19 }
   0x9   : > { %p27_p1 = scmp.eq.s32.totalorder %s26_s26, 0  ;;  %p37_p2 = scmp.eq.s32.totalorder %s2851_s21, 0 }
   0xa   : > { %p42_p3 = scmp.ne.s32.totalorder %s2843_s19, %s2839_s18  ;;  %p3178_p4 = scmp.eq.s32.totalorder %s2917_s22, 0 }
   0xb   : > { %s2933_s27 = scalar_select %p27_p1, %s2847_s20, %s29_s25  }
   0xc   : > { %p2935_p5 = por %p37_p2, %p36_p0  ;;  %p2941_p6 = por %p3178_p4, %p42_p3 }
   0xd   : > { %3181 = sst [smem:[#allocation12_spill]] %s2933_s27  ;;  %p150_p7 = scmp.eq.s32.totalorder %s2917_s22, 2 }
   0xe   : > { %s3182_s28 = scalar_select %p2935_p5, 1, 0 }
   0xf   : > { %s3183_s29 = scalar_select %p2941_p6, 1, 0 }
  0x10   : > { %p156_p8 = scmp.eq.s32.totalorder %s2053_s23, 2  ;;  %p2054_p9 = scmp.ge.s32.totalorder %s2851_s21, 1 }
  0x11   : > { %p163_p10 = scmp.lt.s32.totalorder %s2851_s21, 4  ;;  %p2948_p11 = por %p150_p7, %p36_p0 }
  0x12   : > { %p2952_p12 = por %p156_p8, %p42_p3  ;;  %s2853_s8 = smov [#allocation5]  }
  0x13   : > { %s3184_s30 = scalar_select %p2948_p11, 1, 0 }
  0x14   : > { %s3185_s6 = scalar_select %p2952_p12, 1, 0 }
  0x15   : > { %p2956_p13 = pnand %p2054_p9, %p163_p10  ;;  %s175_s9 = sshll.u32 %s2853_s8, 4  ;;  %s176_s9 = int_to_ptr.vmem [resolvable:$true] %s175_s9 }
  0x16   : > { %s2854_s11 = smov [#allocation7]   ;;  %s2697_s15 = scalar_lea.hbm %s3173_s1, 18432 }
  0x17   : > { %s3186_s7 = scalar_select %p2956_p13, 1, 0 }
  0x18   : > { %p2374_p1 = pneg %p2956_p13  ;;  %s191_s12 = sshll.u32 %s2854_s11, 4  ;;  %s2968_s12 = int_to_ptr.vmem [resolvable:$true] %s191_s12 }
  0x19   : > { %p2698_p0 = scmp.ne.s32.totalorder %s3173_s1, %s2697_s15  ;;  %p2704_p9 = scmp.lt.u32.totalorder %s2697_s15, %s3173_s1 }
  0x1a   : > { %p2964_p2 = pnand %p2374_p1, %p3178_p4 }
  0x1c   : > { %p2699_p3 = pneg %p2964_p2 }
  0x1e   : > { %p2700_p7 = pnand %p2699_p3, %p2698_p0 }
  0x20   : > { %p2701_p8 = pneg %p2700_p7 }
  0x22   : > { %p2706_p10 = pnand %p2704_p9, %p2701_p8 }
  0x24   : > { %2709 = shalt.err (!%p2706_p10)
}
  0x25   : > { %s2710_s26 = scalar_lea.vmem %s176_s9, 18432  ;;  %p2718_p11 = scmp.lt.s32.totalorder %s176_s9, %s176_s9 }
  0x26   : > { %p2711_p1 = scmp.ne.s32.totalorder %s176_s9, %s2710_s26  ;;  %p2719_p6 = scmp.lt.s32.totalorder %s2710_s26, %s2710_s26 }
  0x28   : > { %p2713_p4 = pnand %p2711_p1, %p2699_p3  ;;  %p2720_p13 = por %p2719_p6, %p2718_p11 }
  0x2a   : > { %p2714_p12 = pneg %p2713_p4 }
  0x2c   : > { %p2721_p5 = pnand %p2720_p13, %p2714_p12 }
  0x2e   : > { %2724 = shalt.err (!%p2721_p5)
}
  0x2f   : > { %s2855_s8 = smov 192   ;;  %s2856_s11 = smov 12  }
  0x30   : > { %2377 = dma.hbm_to_vmem [thread:$0]  (!%p2964_p2), %s3173_s1, 18432, %s176_s9, [#allocation6], %s2855_s8, %s2855_s8, %s2856_s11  }
  0x31   : > { %s2725_s17 = scalar_lea.hbm %s3175_s3, 6144 }
  0x32   : > { %p2726_p4 = scmp.ne.s32.totalorder %s3175_s3, %s2725_s17  ;;  %p2732_p11 = scmp.lt.u32.totalorder %s2725_s17, %s3175_s3 }
  0x34   : > { %p2728_p5 = pnand %p2726_p4, %p2699_p3 }
  0x36   : > { %p2729_p6 = pneg %p2728_p5 }
  0x38   : > { %p2734_p12 = pnand %p2732_p11, %p2729_p6 }
  0x3a   : > { %2737 = shalt.err (!%p2734_p12)
}
  0x3b   : > { %s2738_s9 = scalar_lea.vmem %s2968_s12, 6144  ;;  %p2746_p8 = scmp.lt.s32.totalorder %s2968_s12, %s2968_s12 }
  0x3c   : > { %p2739_p13 = scmp.ne.s32.totalorder %s2968_s12, %s2738_s9  ;;  %p2747_p9 = scmp.lt.s32.totalorder %s2738_s9, %s2738_s9 }
  0x3e   : > { %p2741_p0 = pnand %p2739_p13, %p2699_p3  ;;  %p2748_p10 = por %p2747_p9, %p2746_p8 }
  0x40   : > { %p2742_p7 = pneg %p2741_p0 }
  0x42   : > { %p2749_p1 = pnand %p2748_p10, %p2742_p7 }
  0x44   : > { %2752 = shalt.err (!%p2749_p1)
}
  0x45   : > { %s2857_s27 = smov 128   ;;  %s2858_s8 = smov 8  }
  0x46   : > { %2380 = dma.hbm_to_vmem [thread:$0]  (!%p2964_p2), %s3175_s3, 6144, %s2968_s12, [#allocation6], %s2857_s27, %s2857_s27, %s2858_s8  }
  0x47   : > { %p2057_p4 = scmp.ge.s32.totalorder %s2851_s21, 3 }
  0x48   : > { %p3188_p3 = scmp.ne.s32.totalorder (!%p2057_p4), %s3182_s28, 0 }
  0x49   : > { %204 = sbr.rel (%p2057_p4) target bundleno = 116 (0x74), region = 32 }
  0x50   : > { %207 = sbr.rel (!%p3188_p3) target bundleno = 116 (0x74), region = 36  ;;  %s208_s14 = sand.u32 (%p3188_p3), 1, %s2847_s20  }
  0x51   : > { %s2058_s15 = sshll.u32 (%p3188_p3), %s2851_s21, 1  ;;  %s2361_s16 = smul.u32 (%p3188_p3), 96, %s208_s14 }
  0x52   : > { %s214_s17 = ssub.s32 (%p3188_p3), 5, %s2058_s15  ;;  %s3025_s25 = scalar_lea.sflag (%p3188_p3), [#allocation3], %s208_s14 }
  0x53   : > { %p215_p5 = scmp.lt.s32.totalorder (%p3188_p3), %s214_s17, 2  ;;  %s212_s12 = scalar_lea.vmem (%p3188_p3), [#allocation2], %s2361_s16 }
  0x57   : > { %s3201_s17 = smov (!%p215_p5, %s214_s17), 2 }
  0x58   : > { %s3022_s23 = smul.u32 768, %s3201_s17 }
  0x5a   : > { %s220_s10 = ssub.s32 1536, %s3022_s23 }
  0x5b   : > { %221 = vsyncadd %s3025_s25, %s220_s10  ;;  %p2061_p2 = scmp.ne.s32.totalorder %s3022_s23, 0  ;;  %s2362_s28 = smul.u32 1536, %s2851_s21 }
  0x5c   : > { %s227_s26 = sshll.u32 %s212_s12, 4  ;;  %s2757_s15 = scalar_lea.hbm %s3172_s0, 3840  ;;  %s3035_s26 = int_to_ptr.vmem [resolvable:$true] %s227_s26 }
  0x5d   : > { %s3033_s8 = scalar_lea.hbm %s3172_s0, %s2362_s28 }
  0x5e   : > { %s2753_s11 = scalar_lea.hbm %s3033_s8, %s3022_s23  ;;  %p2758_p13 = scmp.lt.u32.totalorder %s3033_s8, %s3172_s0 }
  0x5f   : > { %p2754_p6 = scmp.ne.s32.totalorder %s3033_s8, %s2753_s11  ;;  %p2759_p0 = scmp.lt.u32.totalorder %s2757_s15, %s2753_s11 }
  0x60   : > { %p2761_p8 = scmp.lt.u32.totalorder %s2753_s11, %s3033_s8 }
  0x61   : > { %p2755_p11 = pnand %p2754_p6, %p2061_p2  ;;  %p2760_p7 = por %p2759_p0, %p2758_p13 }
  0x63   : > { %p2756_p12 = pneg %p2755_p11  ;;  %p2762_p9 = por %p2761_p8, %p2760_p7 }
  0x65   : > { %p2763_p10 = pnand %p2762_p9, %p2756_p12 }
  0x67   : > { %2766 = shalt.err (!%p2763_p10)
}
  0x68   : > { %s2767_s10 = scalar_lea.vmem %s3035_s26, %s3022_s23  ;;  %s2859_s12 = smov [#allocation2]  }
  0x69   : > { %p2768_p1 = scmp.ne.s32.totalorder %s3035_s26, %s2767_s10  ;;  %s2771_s28 = sshll.u32 %s2859_s12, 4  ;;  %s2772_s28 = int_to_ptr.vmem [resolvable:$false] %s2771_s28 }
  0x6a   : > { %s2773_s9 = scalar_lea.vmem %s2772_s28, 3072  ;;  %p2774_p5 = scmp.lt.s32.totalorder %s3035_s26, %s2772_s28 }
  0x6b   : > { %p2769_p4 = pnand %p2768_p1, %p2061_p2  ;;  %p2775_p6 = scmp.lt.s32.totalorder %s2773_s9, %s2767_s10 }
  0x6d   : > { %p2770_p3 = pneg %p2769_p4  ;;  %p2776_p11 = por %p2775_p6, %p2774_p5 }
  0x6f   : > { %p2777_p13 = pnand %p2776_p11, %p2770_p3 }
  0x71   : > { %2780 = shalt.err (!%p2777_p13)
}
  0x72   : > { %s2860_s27 = smov 768   ;;  %s2861_s11 = smov 48  }
  0x73   : > { %233 = dma.hbm_to_vmem [thread:$0]  (%p2061_p2), %s3033_s8, %s3022_s23, %s3035_s26, %s3025_s25, %s2860_s27, %s2860_s27, %s2861_s11  }
  0x74 PF: > { %p3189_p12 = scmp.ne.s32.totalorder %s3186_s7, 0 }
  0x75   : > { %s3065_s13 = sand.u32 (!%p3189_p12), 1, %s2843_s19   ;;  %p3190_p0 = scmp.ne.s32.totalorder (!%p3189_p12), %s3183_s29, 0 }
  0x76   : > { %239 = sbr.rel (%p3189_p12) target bundleno = 822 (0x336), region = 40  ;;  %s242_s15 = scalar_lea.sflag (!%p3189_p12), [#allocation3], %s3065_s13 }
  0x77   : > { %s2363_s14 = smul.u32 (!%p3189_p12), 96, %s3065_s13 }
  0x79   : > { %s3069_s16 = scalar_lea.vmem (!%p3189_p12), [#allocation2], %s2363_s14 }
  0x7d   : > { %2826 = dma.done.wait (%p3190_p0), %s242_s15, 1536  }
  0x7e   : > { %2828 = vsyncadd (%p3190_p0), %s242_s15, 4294965760  ;;  %p3191_p2 = scmp.eq.s32.totalorder %s2917_s22, 0 }
  0x80   : > { %2830 = dma.done.wait (%p3191_p2), [#allocation6], 24576   ;;  %p3192_p7 = pmov %p3191_p2 }
  0x81   : > { %v2433_v0 = vld [vmem:[#allocation5 + $0x4] ss:$12 sps:$4 sm:$0xff]   ;;  %v2435_v1 = vld [vmem:[#allocation5] ss:$12 sps:$4 sm:$0xff]   ;;  %v2436_v2 = vld [vmem:[#allocation5 + $0x1c] ss:$12 sps:$4 sm:$0xff]  }
  0x82   : > { %2832 = vsyncadd (%p3192_p7), [#allocation6], 4294942720  ;;  %1288 = vmatprep.subr.bf16.mxu0 %v2433_v0  ;;  %v2438_v3 = vld [vmem:[#allocation5 + $0x18] ss:$12 sps:$4 sm:$0xff]   ;;  %v2439_v4 = vld [vmem:[#allocation5 + $0x34] ss:$12 sps:$4 sm:$0xff]  }
  0x83   : > { %1289 = vmatpush1.bf16.msra.mxu0 %v2435_v1  ;;  %v2441_v5 = vld [vmem:[#allocation5 + $0x30] ss:$12 sps:$4 sm:$0xff]   ;;  %v2442_v6 = vld [vmem:[#allocation5 + $0x4c] ss:$12 sps:$4 sm:$0xff]   ;;  %v2444_v7 = vld [vmem:[#allocation5 + $0x48] ss:$12 sps:$4 sm:$0xff]  }
  0x84   : > { %1290 = vmatprep.subr.bf16.mxu0 %v2436_v2  ;;  %v2445_v8 = vld [vmem:[#allocation5 + $0x64] ss:$12 sps:$4 sm:$0xff]   ;;  %v2447_v9 = vld [vmem:[#allocation5 + $0x60] ss:$12 sps:$4 sm:$0xff]   ;;  %v2448_v10 = vld [vmem:[#allocation5 + $0x7c] ss:$12 sps:$4 sm:$0xff]  }
  0x85   : > { %v2450_v11 = vld [vmem:[#allocation5 + $0x78] ss:$12 sps:$4 sm:$0xff]   ;;  %v2451_v12 = vld [vmem:[#allocation5 + $0x94] ss:$12 sps:$4 sm:$0xff]   ;;  %v294_v13 = vld [vmem:[%s3069_s16 + $0x8] sm:$0xff]  ;;  %s2068_s26 = sshll.u32 %s3065_s13, 5 }
  0x86   : > { %v300_v14 = vld [vmem:[%s3069_s16 + $0x38] sm:$0xff]  ;;  %v2484_v18 = vld [vmem:[#allocation5 + $0xc8] ss:$12 sps:$4 sm:$0xff]   ;;  %v2457_v21 = vld [vmem:[#allocation5 + $0xc4] ss:$12 sps:$4 sm:$0xff]   ;;  %s279_s8 = scalar_lea.vmem [#allocation8], %s2068_s26 }
  0x87   : > { %1291 = vmatpush1.bf16.msra.mxu0 %v2438_v3  ;;  %v306_v15 = vpack.c.bf16 %v300_v14, %v294_v13  ;;  %v2453_v16 = vld [vmem:[#allocation5 + $0x90] ss:$12 sps:$4 sm:$0xff]   ;;  %v2454_v17 = vld [vmem:[#allocation5 + $0xac] ss:$12 sps:$4 sm:$0xff]   ;;  %v2485_v19 = vld [vmem:[#allocation5 + $0x8] ss:$12 sps:$4 sm:$0xff]   ;;  %2275 = vmatprep.subr.bf16.mxu1 %v2484_v18 }
  0x88   : > { %1292 = vmatprep.subr.bf16.mxu0 %v2439_v4  ;;  %v2456_v20 = vld [vmem:[#allocation5 + $0xa8] ss:$12 sps:$4 sm:$0xff]   ;;  %2276 = vmatpush3.bf16.msra.mxu1 %v2485_v19  ;;  %v2489_v22 = vld [vmem:[#allocation5 + $0xe0] ss:$12 sps:$4 sm:$0xff]   ;;  %v2494_v26 = vld [vmem:[#allocation5 + $0xf8] ss:$12 sps:$4 sm:$0xff]  }
  0x89   : > { %1320 = vmatprep.mubr.bf16.mxu0 %v306_v15  ;;  %1449 = vmatprep.mubr.bf16.mxu1 %v306_v15  ;;  %v2490_v23 = vld [vmem:[#allocation5 + $0x20] ss:$12 sps:$4 sm:$0xff]   ;;  %v2460_v25 = vld [vmem:[#allocation5 + $0xdc] ss:$12 sps:$4 sm:$0xff]   ;;  %v2495_v27 = vld [vmem:[#allocation5 + $0x38] ss:$12 sps:$4 sm:$0xff]  }
  0x8a   : > { %v2459_v24 = vld [vmem:[#allocation5 + $0xc0] ss:$12 sps:$4 sm:$0xff]   ;;  %2277 = vmatprep.subr.bf16.mxu1 %v2489_v22  ;;  %v2462_v28 = vld [vmem:[#allocation5 + $0xd8] ss:$12 sps:$4 sm:$0xff]   ;;  %v2499_v29 = vld [vmem:[#allocation5 + $0x110] ss:$12 sps:$4 sm:$0xff]  }
  0x8b   : > { %1293 = vmatpush1.bf16.msra.mxu0 %v2441_v5  ;;  %v2500_v30 = vld [vmem:[#allocation5 + $0x50] ss:$12 sps:$4 sm:$0xff]   ;;  %v2463_v31 = vld [vmem:[#allocation5 + $0xf4] ss:$12 sps:$4 sm:$0xff]   ;;  %v2466_v35 = vld [vmem:[#allocation5 + $0x10c] ss:$12 sps:$4 sm:$0xff]  }
  0x8c   : > { %1294 = vmatprep.subr.bf16.mxu0 %v2442_v6  ;;  %2278 = vmatpush3.bf16.msra.mxu1 %v2490_v23  ;;  %v2465_v32 = vld [vmem:[#allocation5 + $0xf0] ss:$12 sps:$4 sm:$0xff]   ;;  %v2504_v33 = vld [vmem:[#allocation5 + $0x128] ss:$12 sps:$4 sm:$0xff]   ;;  %v2509_v36 = vld [vmem:[#allocation5 + $0x140] ss:$12 sps:$4 sm:$0xff]  }
  0x8d   : > { %2279 = vmatprep.subr.bf16.mxu1 %v2494_v26  ;;  %v2505_v34 = vld [vmem:[#allocation5 + $0x68] ss:$12 sps:$4 sm:$0xff]   ;;  %v2469_v38 = vld [vmem:[#allocation5 + $0x124] ss:$12 sps:$4 sm:$0xff]   ;;  %v2510_v39 = vld [vmem:[#allocation5 + $0x80] ss:$12 sps:$4 sm:$0xff]  }
  0x8e   : > { %v2468_v37 = vld [vmem:[#allocation5 + $0x108] ss:$12 sps:$4 sm:$0xff]   ;;  %v2514_v40 = vld [vmem:[#allocation5 + $0x158] ss:$12 sps:$4 sm:$0xff]   ;;  %v2471_v41 = vld [vmem:[#allocation5 + $0x120] ss:$12 sps:$4 sm:$0xff]  }
  0x8f   : > { %1295 = vmatpush1.bf16.msra.mxu0 %v2444_v7  ;;  %v2472_v42 = vld [vmem:[#allocation5 + $0x13c] ss:$12 sps:$4 sm:$0xff]   ;;  %v2515_v43 = vld [vmem:[#allocation5 + $0x98] ss:$12 sps:$4 sm:$0xff]   ;;  %v2475_v46 = vld [vmem:[#allocation5 + $0x154] ss:$12 sps:$4 sm:$0xff]  }
  0x90   : > { %1296 = vmatprep.subr.bf16.mxu0 %v2445_v8  ;;  %2280 = vmatpush3.bf16.msra.mxu1 %v2495_v27  ;;  %v2519_v44 = vld [vmem:[#allocation5 + $0x170] ss:$12 sps:$4 sm:$0xff]   ;;  %v2474_v45 = vld [vmem:[#allocation5 + $0x138] ss:$12 sps:$4 sm:$0xff]   ;;  %v2524_v48 = vld [vmem:[#allocation5 + $0x248] ss:$12 sps:$4 sm:$0xff]  }
  0x91   : > { %2281 = vmatprep.subr.bf16.mxu1 %v2499_v29  ;;  %v2520_v47 = vld [vmem:[#allocation5 + $0xb0] ss:$12 sps:$4 sm:$0xff]   ;;  %v293_v50 = vld [vmem:[%s3069_s16] sm:$0xff]  ;;  %v2478_v52 = vld [vmem:[#allocation5 + $0x16c] ss:$12 sps:$4 sm:$0xff]   ;;  %s1940_s17 = scalar_lea.sflag [#allocation4], %s3065_s13 }
  0x92   : > { %v2477_v49 = vld [vmem:[#allocation5 + $0x150] ss:$12 sps:$4 sm:$0xff]   ;;  %v2525_v53 = vld [vmem:[#allocation5 + $0x188] ss:$12 sps:$4 sm:$0xff]   ;;  %v2529_v55 = vld [vmem:[#allocation5 + $0x260] ss:$12 sps:$4 sm:$0xff]  }
  0x93   : > { %1297 = vmatpush1.bf16.msra.mxu0 %v2447_v9  ;;  %v299_v51 = vld [vmem:[%s3069_s16 + $0x30] sm:$0xff]  ;;  %v2530_v57 = vld [vmem:[#allocation5 + $0x1a0] ss:$12 sps:$4 sm:$0xff]   ;;  %v2534_v59 = vld [vmem:[#allocation5 + $0x278] ss:$12 sps:$4 sm:$0xff]   ;;  %p3193_p8 = scmp.ne.s32.totalorder %s3184_s30, 0 }
  0x94   : > { %1298 = vmatprep.subr.bf16.mxu0 %v2448_v10  ;;  %2282 = vmatpush3.bf16.msra.mxu1 %v2500_v30  ;;  %v305_v54 = vpack.c.bf16 %v299_v51, %v293_v50  ;;  %v2480_v56 = vld [vmem:[#allocation5 + $0x168] ss:$12 sps:$4 sm:$0xff]   ;;  %v2483_v58 = vld [vmem:[#allocation5 + $0x184] ss:$12 sps:$4 sm:$0xff]   ;;  %v2481_v60 = vld [vmem:[#allocation5 + $0x180] ss:$12 sps:$4 sm:$0xff]  }
  0x95   : > { %2283 = vmatprep.subr.bf16.mxu1 %v2504_v33  ;;  %v2488_v61 = vld [vmem:[#allocation5 + $0x19c] ss:$12 sps:$4 sm:$0xff]   ;;  %v2535_v62 = vld [vmem:[#allocation5 + $0x1b8] ss:$12 sps:$4 sm:$0xff]   ;;  %v2493_v1 = vld [vmem:[#allocation5 + $0x1b4] ss:$12 sps:$4 sm:$0xff]  }
  0x96   : > { %v2539_v63 = vld [vmem:[#allocation5 + $0x290] ss:$12 sps:$4 sm:$0xff]   ;;  %v2486_v0 = vld [vmem:[#allocation5 + $0x198] ss:$12 sps:$4 sm:$0xff]   ;;  %v2544_v3 = vld [vmem:[#allocation5 + $0x2a8] ss:$12 sps:$4 sm:$0xff]  }
  0x97   : > { %1299 = vmatpush1.bf16.msra.mxu0 %v2450_v11  ;;  %v2540_v2 = vld [vmem:[#allocation5 + $0x1d0] ss:$12 sps:$4 sm:$0xff]   ;;  %v2498_v5 = vld [vmem:[#allocation5 + $0x1cc] ss:$12 sps:$4 sm:$0xff]   ;;  %v2545_v6 = vld [vmem:[#allocation5 + $0x1e8] ss:$12 sps:$4 sm:$0xff]  }
  0x98   : > { %1300 = vmatprep.subr.bf16.mxu0 %v2451_v12  ;;  %2284 = vmatpush3.bf16.msra.mxu1 %v2505_v34  ;;  %v2491_v4 = vld [vmem:[#allocation5 + $0x1b0] ss:$12 sps:$4 sm:$0xff]   ;;  %v2549_v7 = vld [vmem:[#allocation5 + $0x2c0] ss:$12 sps:$4 sm:$0xff]   ;;  %v2496_v8 = vld [vmem:[#allocation5 + $0x1c8] ss:$12 sps:$4 sm:$0xff]  }
  0x99   : > { %2285 = vmatprep.subr.bf16.mxu1 %v2509_v36  ;;  %v2503_v9 = vld [vmem:[#allocation5 + $0x1e4] ss:$12 sps:$4 sm:$0xff]   ;;  %v2550_v10 = vld [vmem:[#allocation5 + $0x200] ss:$12 sps:$4 sm:$0xff]   ;;  %v296_v12 = vld [vmem:[%s3069_s16 + $0x18] sm:$0xff]  ;;  %s2262_s10 = sshll.u32 (%p3193_p8), %s2917_s22, 1 }
  0x9a   : > { %v2554_v11 = vld [vmem:[#allocation5 + $0x2d8] ss:$12 sps:$4 sm:$0xff]   ;;  %v302_v13 = vld [vmem:[%s3069_s16 + $0x48] sm:$0xff]  ;;  %v2559_v18 = vld [vmem:[#allocation5 + $0x2f0] ss:$12 sps:$4 sm:$0xff]   ;;  %s1948_s12 = ssub.s32 (%p3193_p8), 5, %s2262_s10 }
  0x9b   : > { %1301 = vmatpush1.bf16.msra.mxu0 %v2453_v16  ;;  %v308_v14 = vpack.c.bf16 %v302_v13, %v296_v12  ;;  %v2501_v15 = vld [vmem:[#allocation5 + $0x1e0] ss:$12 sps:$4 sm:$0xff]   ;;  %v2508_v16 = vld [vmem:[#allocation5 + $0x1fc] ss:$12 sps:$4 sm:$0xff]   ;;  %v2506_v19 = vld [vmem:[#allocation5 + $0x1f8] ss:$12 sps:$4 sm:$0xff]  }
  0x9c   : > { %1302 = vmatprep.subr.bf16.mxu0 %v2454_v17  ;;  %2286 = vmatpush3.bf16.msra.mxu1 %v2510_v39  ;;  %v2555_v17 = vld [vmem:[#allocation5 + $0x218] ss:$12 sps:$4 sm:$0xff]   ;;  %v295_v22 = vld [vmem:[%s3069_s16 + $0x10] sm:$0xff]  ;;  %v2569_v29 = vld [vmem:[#allocation5 + $0x3e0] ss:$12 sps:$4 sm:$0xff]   ;;  %p1949_p9 = scmp.lt.s32.totalorder (%p3193_p8), %s1948_s12, 2 }
  0x9d   : > { %2287 = vmatprep.subr.bf16.mxu1 %v2514_v40  ;;  %v301_v23 = vld [vmem:[%s3069_s16 + $0x40] sm:$0xff]  ;;  %v2565_v27 = vld [vmem:[#allocation5 + $0x308] ss:$12 sps:$4 sm:$0xff]   ;;  %v2580_v40 = vld [vmem:[#allocation5 + $0x350] ss:$12 sps:$4 sm:$0xff]  }
  0x9e   : > { %v3087_v26 = vpack.c.bf16 %v301_v23, %v295_v22  ;;  %v2516_v30 = vld [vmem:[#allocation5 + $0x228] ss:$12 sps:$4 sm:$0xff]   ;;  %v2574_v33 = vld [vmem:[#allocation5 + $0x3f8] ss:$12 sps:$4 sm:$0xff]   ;;  %v2521_v34 = vld [vmem:[#allocation5 + $0x240] ss:$12 sps:$4 sm:$0xff]  }
  0x9f   : > { %1303 = vmatpush1.bf16.msra.mxu0 %v2456_v20  ;;  %v2560_v20 = vld [vmem:[#allocation5 + $0x230] ss:$12 sps:$4 sm:$0xff]   ;;  %v2575_v36 = vld [vmem:[#allocation5 + $0x338] ss:$12 sps:$4 sm:$0xff]   ;;  %v2533_v39 = vld [vmem:[#allocation5 + $0x274] ss:$12 sps:$4 sm:$0xff]  }
  0xa0   : > { %1304 = vmatprep.subr.bf16.mxu0 %v2457_v21  ;;  %2288 = vmatpush3.bf16.msra.mxu1 %v2515_v43  ;;  %v2513_v21 = vld [vmem:[#allocation5 + $0x214] ss:$12 sps:$4 sm:$0xff]   ;;  %v2538_v43 = vld [vmem:[#allocation5 + $0x28c] ss:$12 sps:$4 sm:$0xff]   ;;  %v2543_v50 = vld [vmem:[#allocation5 + $0x2a4] ss:$12 sps:$4 sm:$0xff]  }
  0xa1   : > { %2289 = vmatprep.subr.bf16.mxu1 %v2519_v44  ;;  %v2585_v44 = vld [vmem:[#allocation5 + $0x368] ss:$12 sps:$4 sm:$0xff]   ;;  %v2590_v51 = vld [vmem:[#allocation5 + $0x380] ss:$12 sps:$4 sm:$0xff]   ;;  %v2566_v12 = vld [vmem:[#allocation5 + $0x318] ss:$12 sps:$4 sm:$0xff]  }
  0xa2   : > { %v2573_v13 = vld [vmem:[#allocation5 + $0x334] ss:$12 sps:$4 sm:$0xff]   ;;  %v2639_v22 = vld [vmem:[#allocation7 + $0x44] ss:$8 sps:$4 sm:$0xff]  }
  0xa3   : > { %1305 = vmatpush1.bf16.msra.mxu0 %v2459_v24  ;;  %v2564_v24 = vld [vmem:[#allocation5 + $0x3c8] ss:$12 sps:$4 sm:$0xff]   ;;  %v2586_v23 = vld [vmem:[#allocation5 + $0x378] ss:$12 sps:$4 sm:$0xff]  }
  0xa4   : > { %1306 = vmatprep.subr.bf16.mxu0 %v2460_v25  ;;  %2290 = vmatpush3.bf16.msra.mxu1 %v2520_v47  ;;  %v2511_v25 = vld [vmem:[#allocation5 + $0x210] ss:$12 sps:$4 sm:$0xff]  }
  0xa5   : > { %2297 = vmatprep.subr.bf16.mxu1 %v2524_v48  ;;  %v304_v47 = vld [vmem:[%s3069_s16 + $0x58] sm:$0xff] }
  0xa7   : > { %1307 = vmatpush1.bf16.msra.mxu0 %v2462_v28  ;;  %1450 = vmatmul.mubr.bf16.vlgmr.msra.gmra.mrb[0].mxu1 %v305_v54  ;;  %v2518_v28 = vld [vmem:[#allocation5 + $0x22c] ss:$12 sps:$4 sm:$0xff]  }
  0xa8   : > { %1308 = vmatprep.subr.bf16.mxu0 %v2463_v31  ;;  %2298 = vmatpush3.bf16.msra.mxu1 %v2525_v53  ;;  %v2523_v31 = vld [vmem:[#allocation5 + $0x244] ss:$12 sps:$4 sm:$0xff]   ;;  %v2541_v53 = vld [vmem:[#allocation5 + $0x2a0] ss:$12 sps:$4 sm:$0xff]  }
  0xa9   : > { %2299 = vmatprep.subr.bf16.mxu1 %v2529_v55  ;;  %1490 = vmatprep.mubr.bf16.mxu1 %v308_v14  ;;  %v2595_v55 = vld [vmem:[#allocation5 + $0x398] ss:$12 sps:$4 sm:$0xff]  }
  0xab   : > { %1309 = vmatpush1.bf16.msra.mxu0 %v2465_v32  ;;  %v2570_v32 = vld [vmem:[#allocation5 + $0x320] ss:$12 sps:$4 sm:$0xff]  }
  0xac   : > { %1310 = vmatprep.subr.bf16.mxu0 %v2466_v35  ;;  %2300 = vmatpush3.bf16.msra.mxu1 %v2530_v57  ;;  %v2528_v35 = vld [vmem:[#allocation5 + $0x25c] ss:$12 sps:$4 sm:$0xff]   ;;  %v2546_v57 = vld [vmem:[#allocation5 + $0x2b8] ss:$12 sps:$4 sm:$0xff]  }
  0xad   : > { %2301 = vmatprep.subr.bf16.mxu1 %v2534_v59  ;;  %v297_v59 = vld [vmem:[%s3069_s16 + $0x20] sm:$0xff] }
  0xaf   : > { %1311 = vmatpush1.bf16.msra.mxu0 %v2468_v37  ;;  %v2579_v37 = vld [vmem:[#allocation5 + $0x410] ss:$12 sps:$4 sm:$0xff]  }
  0xb0   : > { %1312 = vmatprep.subr.bf16.mxu0 %v2469_v38  ;;  %2302 = vmatpush3.bf16.msra.mxu1 %v2535_v62  ;;  %v2526_v38 = vld [vmem:[#allocation5 + $0x258] ss:$12 sps:$4 sm:$0xff]  }
  0xb1   : > { %2303 = vmatprep.subr.bf16.mxu1 %v2539_v63  ;;  %v2627_v62 = vld [vmem:[#allocation7 + $0x4] ss:$8 sps:$4 sm:$0xff]   ;;  %v2551_v63 = vld [vmem:[#allocation5 + $0x2d0] ss:$12 sps:$4 sm:$0xff]  }
  0xb3   : > { %1313 = vmatpush1.bf16.msra.mxu0 %v2471_v41  ;;  %v2584_v41 = vld [vmem:[#allocation5 + $0x428] ss:$12 sps:$4 sm:$0xff]  }
  0xb4   : > { %1314 = vmatprep.subr.bf16.mxu0 %v2472_v42  ;;  %2304 = vmatpush3.bf16.msra.mxu1 %v2540_v2  ;;  %v2531_v42 = vld [vmem:[#allocation5 + $0x270] ss:$12 sps:$4 sm:$0xff]   ;;  %v2625_v2 = vld [vmem:[#allocation7] ss:$8 sps:$4 sm:$0xff]  }
  0xb5   : > { %2305 = vmatprep.subr.bf16.mxu1 %v2544_v3  ;;  %v2630_v3 = vld [vmem:[#allocation7 + $0x14] ss:$8 sps:$4 sm:$0xff]  }
  0xb7   : > { %1315 = vmatpush1.bf16.msra.mxu0 %v2474_v45  ;;  %v2589_v45 = vld [vmem:[#allocation5 + $0x440] ss:$12 sps:$4 sm:$0xff]  }
  0xb8   : > { %1316 = vmatprep.subr.bf16.mxu0 %v2475_v46  ;;  %2306 = vmatpush3.bf16.msra.mxu1 %v2545_v6  ;;  %v298_v46 = vld [vmem:[%s3069_s16 + $0x28] sm:$0xff]  ;;  %v2563_v6 = vld [vmem:[#allocation5 + $0x304] ss:$12 sps:$4 sm:$0xff]  }
  0xb9   : > { %2307 = vmatprep.subr.bf16.mxu1 %v2549_v7  ;;  %v310_v48 = vpack.c.bf16 %v304_v47, %v298_v46  ;;  %v2633_v7 = vld [vmem:[#allocation7 + $0x24] ss:$8 sps:$4 sm:$0xff]   ;;  %v2643_v46 = vld [vmem:[#allocation7 + $0x60] ss:$8 sps:$4 sm:$0xff]  }
  0xba   : > { %v2645_v47 = vld [vmem:[#allocation7 + $0x64] ss:$8 sps:$4 sm:$0xff]  }
  0xbb   : > { %1317 = vmatpush1.bf16.msra.mxu0 %v2477_v49  ;;  %v2536_v49 = vld [vmem:[#allocation5 + $0x288] ss:$12 sps:$4 sm:$0xff]  }
  0xbc   : > { %1318 = vmatprep.subr.bf16.mxu0 %v2478_v52  ;;  %2308 = vmatpush3.bf16.msra.mxu1 %v2550_v10  ;;  %v2594_v52 = vld [vmem:[#allocation5 + $0x458] ss:$12 sps:$4 sm:$0xff]   ;;  %v2631_v10 = vld [vmem:[#allocation7 + $0x20] ss:$8 sps:$4 sm:$0xff]  }
  0xbd   : > { %2309 = vmatprep.subr.bf16.mxu1 %v2554_v11  ;;  %v2636_v11 = vld [vmem:[#allocation7 + $0x34] ss:$8 sps:$4 sm:$0xff]  }
  0xbf   : > { %1319 = vmatpush1.bf16.msra.mxu0 %v2480_v56  ;;  %v2599_v56 = vld [vmem:[#allocation5 + $0x470] ss:$12 sps:$4 sm:$0xff]  }
  0xc0   : > { %1331 = vmatprep.subr.bf16.mxu0 %v2483_v58  ;;  %2310 = vmatpush3.bf16.msra.mxu1 %v2555_v17  ;;  %v2600_v58 = vld [vmem:[#allocation5 + $0x3b0] ss:$12 sps:$4 sm:$0xff]   ;;  %v2576_v17 = vld [vmem:[#allocation5 + $0x348] ss:$12 sps:$4 sm:$0xff]  }
  0xc1   : > { %2311 = vmatprep.subr.bf16.mxu1 %v2559_v18  ;;  %v2583_v18 = vld [vmem:[#allocation5 + $0x364] ss:$12 sps:$4 sm:$0xff]  }
  0xc2   : > { %1321 = vmatmul.mubr.bf16.vlgmr.msra.gmra.mrb[0].mxu0 %v305_v54  ;;  %v2548_v54 = vld [vmem:[#allocation5 + $0x2bc] ss:$12 sps:$4 sm:$0xff]  }
  0xc3   : > { %1332 = vmatpush1.bf16.msra.mxu0 %v2481_v60  ;;  %1363 = vmatprep.mubr.bf16.mxu0 %v308_v14  ;;  %v303_v60 = vld [vmem:[%s3069_s16 + $0x50] sm:$0xff] }
  0xc4   : > { %1333 = vmatprep.subr.bf16.mxu0 %v2488_v61  ;;  %2312 = vmatpush3.bf16.msra.mxu1 %v2560_v20  ;;  %v2553_v61 = vld [vmem:[#allocation5 + $0x2d4] ss:$12 sps:$4 sm:$0xff]   ;;  %v2634_v14 = vld [vmem:[#allocation7 + $0x30] ss:$8 sps:$4 sm:$0xff]   ;;  %v2588_v20 = vld [vmem:[#allocation5 + $0x37c] ss:$12 sps:$4 sm:$0xff]  }
  0xc5   : > { %2319 = vmatprep.subr.bf16.mxu1 %v2564_v24  ;;  %v2593_v24 = vld [vmem:[#allocation5 + $0x394] ss:$12 sps:$4 sm:$0xff]  }
  0xc7   : > { %1334 = vmatpush1.bf16.msra.mxu0 %v2486_v0  ;;  %1491 = vmatmul.mubr.bf16.vlgmr.msra.gmra.mrb[4].mxu1 %v3087_v26  ;;  %v3094_v0 = vpack.c.bf16 %v303_v60, %v297_v59  ;;  %v2661_v59 = vld [vmem:[#allocation7 + $0xc0] ss:$8 sps:$4 sm:$0xff]   ;;  %v2666_v60 = vld [vmem:[#allocation7 + $0xd4] ss:$8 sps:$4 sm:$0xff]  }
  0xc8   : > { %1335 = vmatprep.subr.bf16.mxu0 %v2493_v1  ;;  %2320 = vmatpush3.bf16.msra.mxu1 %v2565_v27  ;;  %v2558_v1 = vld [vmem:[#allocation5 + $0x2ec] ss:$12 sps:$4 sm:$0xff]   ;;  %v2596_v27 = vld [vmem:[#allocation5 + $0x3a8] ss:$12 sps:$4 sm:$0xff]  }
  0xc9   : > { %2321 = vmatprep.subr.bf16.mxu1 %v2569_v29  ;;  %1531 = vmatprep.mubr.bf16.mxu1 %v310_v48  ;;  %v2601_v29 = vld [vmem:[#allocation5 + $0x3c0] ss:$12 sps:$4 sm:$0xff]  }
  0xcb   : > { %1336 = vmatpush1.bf16.msra.mxu0 %v2491_v4  ;;  %v2556_v4 = vld [vmem:[#allocation5 + $0x2e8] ss:$12 sps:$4 sm:$0xff]  }
  0xcc   : > { %1337 = vmatprep.subr.bf16.mxu0 %v2498_v5  ;;  %2322 = vmatpush3.bf16.msra.mxu1 %v2570_v32  ;;  %v2628_v5 = vld [vmem:[#allocation7 + $0x10] ss:$8 sps:$4 sm:$0xff]   ;;  %v2609_v32 = vld [vmem:[#allocation5 + $0x3f4] ss:$12 sps:$4 sm:$0xff]  }
  0xcd   : > { %2323 = vmatprep.subr.bf16.mxu1 %v2574_v33  ;;  %v2607_v33 = vld [vmem:[#allocation5 + $0x3f0] ss:$12 sps:$4 sm:$0xff]  }
  0xcf   : > { %1338 = vmatpush1.bf16.msra.mxu0 %v2496_v8  ;;  %v2561_v8 = vld [vmem:[#allocation5 + $0x300] ss:$12 sps:$4 sm:$0xff]  }
  0xd0   : > { %1339 = vmatprep.subr.bf16.mxu0 %v2503_v9  ;;  %2324 = vmatpush3.bf16.msra.mxu1 %v2575_v36  ;;  %v2568_v9 = vld [vmem:[#allocation5 + $0x31c] ss:$12 sps:$4 sm:$0xff]   ;;  %v2615_v36 = vld [vmem:[#allocation5 + $0x424] ss:$12 sps:$4 sm:$0xff]  }
  0xd1   : > { %2325 = vmatprep.subr.bf16.mxu1 %v2579_v37  ;;  %v2613_v37 = vld [vmem:[#allocation5 + $0x420] ss:$12 sps:$4 sm:$0xff]  }
  0xd3   : > { %1340 = vmatpush1.bf16.msra.mxu0 %v2501_v15  ;;  %v2571_v15 = vld [vmem:[#allocation5 + $0x330] ss:$12 sps:$4 sm:$0xff]  }
  0xd4   : > { %1341 = vmatprep.subr.bf16.mxu0 %v2508_v16  ;;  %2326 = vmatpush3.bf16.msra.mxu1 %v2580_v40  ;;  %v2578_v16 = vld [vmem:[#allocation5 + $0x34c] ss:$12 sps:$4 sm:$0xff]   ;;  %v2642_v40 = vld [vmem:[#allocation7 + $0x54] ss:$8 sps:$4 sm:$0xff]  }
  0xd5   : > { %2327 = vmatprep.subr.bf16.mxu1 %v2584_v41  ;;  %v2616_v41 = vld [vmem:[#allocation5 + $0x438] ss:$12 sps:$4 sm:$0xff]  }
  0xd7   : > { %1342 = vmatpush1.bf16.msra.mxu0 %v2506_v19  ;;  %v2581_v19 = vld [vmem:[#allocation5 + $0x360] ss:$12 sps:$4 sm:$0xff]  }
  0xd8   : > { %1343 = vmatprep.subr.bf16.mxu0 %v2513_v21  ;;  %2328 = vmatpush3.bf16.msra.mxu1 %v2585_v44  ;;  %v2637_v21 = vld [vmem:[#allocation7 + $0x40] ss:$8 sps:$4 sm:$0xff]   ;;  %v2624_v44 = vld [vmem:[#allocation5 + $0x46c] ss:$12 sps:$4 sm:$0xff]  }
  0xd9   : > { %2329 = vmatprep.subr.bf16.mxu1 %v2589_v45  ;;  %v2622_v45 = vld [vmem:[#allocation5 + $0x468] ss:$12 sps:$4 sm:$0xff]  }
  0xdb   : > { %1344 = vmatpush1.bf16.msra.mxu0 %v2511_v25  ;;  %v2591_v25 = vld [vmem:[#allocation5 + $0x390] ss:$12 sps:$4 sm:$0xff]  }
  0xdc   : > { %1345 = vmatprep.subr.bf16.mxu0 %v2518_v28  ;;  %2330 = vmatpush3.bf16.msra.mxu1 %v2590_v51  ;;  %v2603_v28 = vld [vmem:[#allocation5 + $0x3c4] ss:$12 sps:$4 sm:$0xff]   ;;  %v2649_v51 = vld [vmem:[#allocation7 + $0x80] ss:$8 sps:$4 sm:$0xff]  }
  0xdd   : > { %2331 = vmatprep.subr.bf16.mxu1 %v2594_v52  ;;  %v2654_v52 = vld [vmem:[#allocation7 + $0x94] ss:$8 sps:$4 sm:$0xff]  }
  0xdf   : > { %1346 = vmatpush1.bf16.msra.mxu0 %v2516_v30  ;;  %v2606_v30 = vld [vmem:[#allocation5 + $0x3dc] ss:$12 sps:$4 sm:$0xff]  }
  0xe0   : > { %1347 = vmatprep.subr.bf16.mxu0 %v2523_v31  ;;  %2332 = vmatpush3.bf16.msra.mxu1 %v2595_v55  ;;  %v2604_v31 = vld [vmem:[#allocation5 + $0x3d8] ss:$12 sps:$4 sm:$0xff]   ;;  %v2655_v55 = vld [vmem:[#allocation7 + $0xa0] ss:$8 sps:$4 sm:$0xff]  }
  0xe1   : > { %2333 = vmatprep.subr.bf16.mxu1 %v2599_v56  ;;  %v2660_v56 = vld [vmem:[#allocation7 + $0xb4] ss:$8 sps:$4 sm:$0xff]  }
  0xe3   : > { %1348 = vmatpush1.bf16.msra.mxu0 %v2521_v34  ;;  %v2612_v34 = vld [vmem:[#allocation5 + $0x40c] ss:$12 sps:$4 sm:$0xff]  }
  0xe4   : > { %1349 = vmatprep.subr.bf16.mxu0 %v2528_v35  ;;  %2334 = vmatpush3.bf16.msra.mxu1 %v2600_v58  ;;  %v2610_v35 = vld [vmem:[#allocation5 + $0x408] ss:$12 sps:$4 sm:$0xff]   ;;  %v2663_v58 = vld [vmem:[#allocation7 + $0xc4] ss:$8 sps:$4 sm:$0xff]  }
  0xe5   : > { %1849 = vmatprep.subr.bf16.mxu1 %v2627_v62 }
  0xe7   : > { %1350 = vmatpush1.bf16.msra.mxu0 %v2526_v38  ;;  %1532 = vmatmul.mubr.bf16.vlgmr.msra.gmra.mrb[8].mxu1 %v3094_v0  ;;  %v2618_v38 = vld [vmem:[#allocation5 + $0x43c] ss:$12 sps:$4 sm:$0xff]  }
  0xe8   : > { %1351 = vmatprep.subr.bf16.mxu0 %v2533_v39  ;;  %1850 = vmatpush1.bf16.msra.mxu1 %v2625_v2  ;;  %v2640_v39 = vld [vmem:[#allocation7 + $0x50] ss:$8 sps:$4 sm:$0xff]  }
  0xe9   : > { %1851 = vmatprep.subr.bf16.mxu1 %v2630_v3 }
  0xeb   : > { %1352 = vmatpush1.bf16.msra.mxu0 %v2531_v42  ;;  %v2621_v42 = vld [vmem:[#allocation5 + $0x454] ss:$12 sps:$4 sm:$0xff]  }
  0xec   : > { %1353 = vmatprep.subr.bf16.mxu0 %v2538_v43  ;;  %1852 = vmatpush1.bf16.msra.mxu1 %v2628_v5  ;;  %v2619_v43 = vld [vmem:[#allocation5 + $0x450] ss:$12 sps:$4 sm:$0xff]   ;;  %v2667_v5 = vld [vmem:[#allocation7 + $0xe0] ss:$8 sps:$4 sm:$0xff]  }
  0xed   : > { %1853 = vmatprep.subr.bf16.mxu1 %v2633_v7  ;;  %v2670_v7 = vld [vmem:[#allocation7 + $0xf0] ss:$8 sps:$4 sm:$0xff]  }
  0xef   : > { %1354 = vmatpush1.bf16.msra.mxu0 %v2536_v49  ;;  %v2648_v49 = vld [vmem:[#allocation7 + $0x74] ss:$8 sps:$4 sm:$0xff]  }
  0xf0   : > { %1355 = vmatprep.subr.bf16.mxu0 %v2543_v50  ;;  %1854 = vmatpush1.bf16.msra.mxu1 %v2631_v10  ;;  %v2651_v50 = vld [vmem:[#allocation7 + $0x84] ss:$8 sps:$4 sm:$0xff]  }
  0xf1   : > { %1855 = vmatprep.subr.bf16.mxu1 %v2636_v11 }
  0xf3   : > { %1356 = vmatpush1.bf16.msra.mxu0 %v2541_v53  ;;  %v2652_v53 = vld [vmem:[#allocation7 + $0x90] ss:$8 sps:$4 sm:$0xff]  }
  0xf4   : > { %1357 = vmatprep.subr.bf16.mxu0 %v2548_v54  ;;  %1856 = vmatpush1.bf16.msra.mxu1 %v2634_v14  ;;  %v2657_v54 = vld [vmem:[#allocation7 + $0xa4] ss:$8 sps:$4 sm:$0xff]  }
  0xf5   : > { %1857 = vmatprep.subr.bf16.mxu1 %v2639_v22 }
  0xf7   : > { %1358 = vmatpush1.bf16.msra.mxu0 %v2546_v57  ;;  %v2658_v57 = vld [vmem:[#allocation7 + $0xb0] ss:$8 sps:$4 sm:$0xff]  }
  0xf8   : > { %1359 = vmatprep.subr.bf16.mxu0 %v2553_v61  ;;  %1858 = vmatpush1.bf16.msra.mxu1 %v2637_v21  ;;  %v2664_v61 = vld [vmem:[#allocation7 + $0xd0] ss:$8 sps:$4 sm:$0xff]  }
  0xf9   : > { %1859 = vmatprep.subr.bf16.mxu1 %v2642_v40 }
  0xfb   : > { %1360 = vmatpush1.bf16.msra.mxu0 %v2551_v63 }
  0xfc   : > { %1361 = vmatprep.subr.bf16.mxu0 %v2558_v1  ;;  %1860 = vmatpush1.bf16.msra.mxu1 %v2640_v39 }
  0xfd   : > { %1861 = vmatprep.subr.bf16.mxu1 %v2645_v47 }
  0xff   : > { %1362 = vmatpush1.bf16.msra.mxu0 %v2556_v4  ;;  %v2669_v4 = vld [vmem:[#allocation7 + $0xe4] ss:$8 sps:$4 sm:$0xff]  }
 0x100   : > { %1374 = vmatprep.subr.bf16.mxu0 %v2563_v6  ;;  %1862 = vmatpush1.bf16.msra.mxu1 %v2643_v46  ;;  %v2672_v6 = vld [vmem:[#allocation7 + $0xf4] ss:$8 sps:$4 sm:$0xff]  }
 0x101   : > { %1863 = vmatprep.subr.bf16.mxu1 %v2648_v49 }
 0x102   : > { %1364 = vmatmul.mubr.bf16.vlgmr.msra.gmra.mrb[0].mxu0 %v3087_v26  ;;  %v2598_v26 = vld [vmem:[#allocation5 + $0x3ac] ss:$12 sps:$4 sm:$0xff]  }
 0x103   : > { %1375 = vmatpush1.bf16.msra.mxu0 %v2561_v8  ;;  %1406 = vmatprep.mubr.bf16.mxu0 %v310_v48  ;;  %v2646_v48 = vld [vmem:[#allocation7 + $0x70] ss:$8 sps:$4 sm:$0xff]   ;;  %v505_v8 = vlaneseq }
 0x104   : > { %1376 = vmatprep.subr.bf16.mxu0 %v2568_v9  ;;  %1864 = vmatpush1.bf16.msra.mxu1 %v2646_v48  ;;  %v2675_v9 = vld [vmem:[#allocation7 + $0x104] ss:$8 sps:$4 sm:$0xff]  }
 0x105   : > { %1865 = vmatprep.subr.bf16.mxu1 %v2651_v50  ;;  %v3099_v10 = vshrl.u32 %v505_v8, 7 }
 0x107   : > { %1377 = vmatpush1.bf16.msra.mxu0 %v2566_v12  ;;  %v515_v11 = vsub.s32 2, %v3099_v10  ;;  %v503_v12 = vld [vmem:[%s3174_s2] sm:$0x7] }
 0x108   : > { %1378 = vmatprep.subr.bf16.mxu0 %v2573_v13  ;;  %1866 = vmatpush1.bf16.msra.mxu1 %v2649_v51 }
 0x109   : > { %1867 = vmatprep.subr.bf16.mxu1 %v2654_v52  ;;  %v516_v13 = vrot.slane %v503_v12, %v515_v11 }
 0x10b   : > { %1379 = vmatpush1.bf16.msra.mxu0 %v2571_v15 }
 0x10c   : > { %1380 = vmatprep.subr.bf16.mxu0 %v2578_v16  ;;  %1868 = vmatpush1.bf16.msra.mxu1 %v2652_v53  ;;  %v2673_v53 = vld [vmem:[#allocation7 + $0x100] ss:$8 sps:$4 sm:$0xff]  }
 0x10d   : > { %1869 = vmatprep.subr.bf16.mxu1 %v2657_v54  ;;  %v2678_v54 = vld [vmem:[#allocation7 + $0x114] ss:$8 sps:$4 sm:$0xff]  }
 0x10f   : > { %1381 = vmatpush1.bf16.msra.mxu0 %v2576_v17 }
 0x110   : > { %1382 = vmatprep.subr.bf16.mxu0 %v2583_v18  ;;  %1870 = vmatpush1.bf16.msra.mxu1 %v2655_v55  ;;  %v2676_v55 = vld [vmem:[#allocation7 + $0x110] ss:$8 sps:$4 sm:$0xff]  }
 0x111   : > { %1871 = vmatprep.subr.bf16.mxu1 %v2660_v56  ;;  %v2862_v56 = vmov 0  }
 0x113   : > { %1383 = vmatpush1.bf16.msra.mxu0 %v2581_v19 }
 0x114   : > { %1384 = vmatprep.subr.bf16.mxu0 %v2588_v20  ;;  %1872 = vmatpush1.bf16.msra.mxu1 %v2658_v57  ;;  %v2681_v57 = vld [vmem:[#allocation7 + $0x124] ss:$8 sps:$4 sm:$0xff]  }
 0x115   : > { %1873 = vmatprep.subr.bf16.mxu1 %v2663_v58  ;;  %v2679_v58 = vld [vmem:[#allocation7 + $0x120] ss:$8 sps:$4 sm:$0xff]  }
 0x117   : > { %1385 = vmatpush1.bf16.msra.mxu0 %v2586_v23 }
 0x118   : > { %1386 = vmatprep.subr.bf16.mxu0 %v2593_v24  ;;  %1874 = vmatpush1.bf16.msra.mxu1 %v2661_v59  ;;  %v2684_v59 = vld [vmem:[#allocation7 + $0x134] ss:$8 sps:$4 sm:$0xff]  }
 0x119   : > { %1875 = vmatprep.subr.bf16.mxu1 %v2666_v60  ;;  %v2682_v60 = vld [vmem:[#allocation7 + $0x130] ss:$8 sps:$4 sm:$0xff]  }
 0x11b   : > { %1387 = vmatpush1.bf16.msra.mxu0 %v2591_v25 }
 0x11c   : > { %1388 = vmatprep.subr.bf16.mxu0 %v2598_v26  ;;  %1876 = vmatpush1.bf16.msra.mxu1 %v2664_v61  ;;  %v2687_v61 = vld [vmem:[#allocation7 + $0x144] ss:$8 sps:$4 sm:$0xff]  }
 0x11d   : > { %1877 = vmatprep.subr.bf16.mxu1 %v2669_v4  ;;  %v2694_v4 = vld [vmem:[#allocation7 + $0x170] ss:$8 sps:$4 sm:$0xff]  }
 0x11f   : > { %1389 = vmatpush1.bf16.msra.mxu0 %v2596_v27 }
 0x120   : > { %1390 = vmatprep.subr.bf16.mxu0 %v2603_v28  ;;  %1878 = vmatpush1.bf16.msra.mxu1 %v2667_v5  ;;  %v1597_v5 = vld [vmem:[%s3176_s4] sm:$0x3] }
 0x121   : > { %1879 = vmatprep.subr.bf16.mxu1 %v2672_v6 }
 0x123   : > { %1391 = vmatpush1.bf16.msra.mxu0 %v2601_v29 }
 0x124   : > { %1392 = vmatprep.subr.bf16.mxu0 %v2606_v30  ;;  %1880 = vmatpush1.bf16.msra.mxu1 %v2670_v7 }
 0x125   : > { %1892 = vmatprep.subr.bf16.mxu1 %v2675_v9 }
 0x127   : > { %1393 = vmatpush1.bf16.msra.mxu0 %v2604_v31 }
 0x128   : > { %1394 = vmatprep.subr.bf16.mxu0 %v2609_v32 }
 0x12b   : > { %1395 = vmatpush1.bf16.msra.mxu0 %v2607_v33 }
 0x12c   : > { %1396 = vmatprep.subr.bf16.mxu0 %v2612_v34 }
 0x12f   : > { %1397 = vmatpush1.bf16.msra.mxu0 %v2610_v35  ;;  %v507_v35 = vsub.s32 0, %v3099_v10 }
 0x130   : > { %1398 = vmatprep.subr.bf16.mxu0 %v2615_v36  ;;  %v511_v36 = vsub.s32 1, %v3099_v10 }
 0x131   : > { %v1602_v6 = vrot.slane %v1597_v5, %v507_v35 }
 0x132   : > { %v1606_v7 = vrot.slane %v1597_v5, %v511_v36 }
 0x133   : > { %1399 = vmatpush1.bf16.msra.mxu0 %v2613_v37  ;;  %v508_v37 = vrot.slane %v503_v12, %v507_v35 }
 0x134   : > { %1400 = vmatprep.subr.bf16.mxu0 %v2618_v38  ;;  %v512_v38 = vrot.slane %v503_v12, %v511_v36 }
 0x137   : > { %1401 = vmatpush1.bf16.msra.mxu0 %v2616_v41 }
 0x138   : > { %1402 = vmatprep.subr.bf16.mxu0 %v2621_v42 }
 0x13b   : > { %1403 = vmatpush1.bf16.msra.mxu0 %v2619_v43 }
 0x13c   : > { %1404 = vmatprep.subr.bf16.mxu0 %v2624_v44 }
 0x13f   : > { %1405 = vmatpush1.bf16.msra.mxu0 %v2622_v45 }
 0x142   : > { %1407 = vmatmul.mubr.bf16.vlgmr.msra.gmra.mrb[0].mxu0 %v3094_v0 }
 0x17a   : > { %v2291_v62 = vpop.f32.mrb[0].mxu1 }
 0x17b   : > { %v2292_v63 = vpop.f32.mrb[1].mxu1 }
 0x17c   : > { %v2293_v0 = vadd.f32 %v2292_v63, %v2291_v62  ;;  %v2294_v1 = vpop.f32.mrb[2].mxu1  ;;  %v2685_v62 = vld [vmem:[#allocation7 + $0x140] ss:$8 sps:$4 sm:$0xff]   ;;  %v2690_v63 = vld [vmem:[#allocation7 + $0x154] ss:$8 sps:$4 sm:$0xff]  }
 0x17d   : > { %v2295_v2 = vpop.f32.mrb[3].mxu1 }
 0x17e   : > { %v2296_v3 = vadd.f32 %v2295_v2, %v2294_v1  ;;  %v1452_v14 = vadd.f32 %v2293_v0, %v516_v13  ;;  %v2688_v0 = vld [vmem:[#allocation7 + $0x150] ss:$8 sps:$4 sm:$0xff]   ;;  %v2693_v1 = vld [vmem:[#allocation7 + $0x164] ss:$8 sps:$4 sm:$0xff]   ;;  %v2691_v2 = vld [vmem:[#allocation7 + $0x160] ss:$8 sps:$4 sm:$0xff]  }
 0x180   : > { %v1455_v17 = vadd.f32 %v2296_v3, %v516_v13  ;;  %v2696_v3 = vld [vmem:[#allocation7 + $0x174] ss:$8 sps:$4 sm:$0xff]  }
 0x19a   : > { %v2313_v15 = vpop.f32.mrb[4].mxu1 }
 0x19b   : > { %v2314_v16 = vpop.f32.mrb[5].mxu1 }
 0x19c   : > { %v2315_v18 = vadd.f32 %v2314_v16, %v2313_v15  ;;  %v2316_v19 = vpop.f32.mrb[6].mxu1 }
 0x19d   : > { %v2317_v20 = vpop.f32.mrb[7].mxu1 }
 0x19e   : > { %v1493_v21 = vadd.f32 %v2315_v18, %v1452_v14  ;;  %v2318_v22 = vadd.f32 %v2317_v20, %v2316_v19 }
 0x1a0   : > { %v1496_v23 = vadd.f32 %v2318_v22, %v1455_v17 }
 0x1ba   : > { %v2335_v24 = vpop.f32.mrb[8].mxu1 }
 0x1bb   : > { %v2336_v25 = vpop.f32.mrb[9].mxu1 }
 0x1bc   : > { %v2337_v26 = vadd.f32 %v2336_v25, %v2335_v24  ;;  %v2338_v27 = vpop.f32.mrb[10].mxu1 }
 0x1bd   : > { %v2339_v28 = vpop.f32.mrb[11].mxu1 }
 0x1be   : > { %v1534_v29 = vadd.f32 %v2337_v26, %v1493_v21  ;;  %v2340_v30 = vadd.f32 %v2339_v28, %v2338_v27 }
 0x1c0   : > { %v1542_v31 = vmax.f32 %v1534_v29, 0.0  ;;  %v1537_v32 = vadd.f32 %v2340_v30, %v1496_v23 }
 0x1c2   : > { %v1545_v33 = vmax.f32 %v1537_v32, 0.0 }
 0x1c4   : > { %v1548_v34 = vpack.c.bf16 %v1545_v33, %v1542_v31 }
 0x215   : > { %v1408_v39 = vpop.f32.mrb[0].mxu0 }
 0x216   : > { %v2341_v40 = vadd.f32 %v1408_v39, %v508_v37  ;;  %v1410_v41 = vpop.f32.mrb[1].mxu0 }
 0x217   : > { %v2342_v42 = vadd.f32 %v1410_v41, %v512_v38  ;;  %v1412_v43 = vpop.f32.mrb[2].mxu0 }
 0x218   : > { %v2343_v44 = vadd.f32 %v1412_v43, %v508_v37  ;;  %v1414_v45 = vpop.f32.mrb[3].mxu0  ;;  %v1540_v47 = vmax.f32 %v2341_v40, 0.0 }
 0x219   : > { %v2344_v46 = vadd.f32 %v1414_v45, %v512_v38  ;;  %v1541_v49 = vmax.f32 %v2342_v42, 0.0 }
 0x21a   : > { %v1543_v48 = vmax.f32 %v2343_v44, 0.0 }
 0x21b   : > { %v1544_v50 = vmax.f32 %v2344_v46, 0.0 }
 0x21c   : > { %v1546_v51 = vpack.c.bf16 %v1543_v48, %v1540_v47 }
 0x21d   : > { %v1547_v52 = vpack.c.bf16 %v1544_v50, %v1541_v49 }
 0x21f   : > { %1881 = vmatprep.mubr.bf16.mxu1 %v1547_v52 }
 0x220   : > { %1882 = vmatmul.mubr.bf16.vlgmr.msra.gmra.mrb[12].mxu1 %v1546_v51 }
 0x221   : > { %1893 = vmatpush1.bf16.msra.mxu1 %v2673_v53  ;;  %1924 = vmatprep.mubr.bf16.mxu1 %v2862_v56 }
 0x222   : > { %1894 = vmatprep.subr.bf16.mxu1 %v2678_v54 }
 0x225   : > { %1895 = vmatpush1.bf16.msra.mxu1 %v2676_v55 }
 0x226   : > { %1896 = vmatprep.subr.bf16.mxu1 %v2681_v57 }
 0x229   : > { %1897 = vmatpush1.bf16.msra.mxu1 %v2679_v58 }
 0x22a   : > { %1898 = vmatprep.subr.bf16.mxu1 %v2684_v59 }
 0x22d   : > { %1899 = vmatpush1.bf16.msra.mxu1 %v2682_v60 }
 0x22e   : > { %1900 = vmatprep.subr.bf16.mxu1 %v2687_v61 }
 0x231   : > { %1901 = vmatpush1.bf16.msra.mxu1 %v2685_v62 }
 0x232   : > { %1902 = vmatprep.subr.bf16.mxu1 %v2690_v63 }
 0x235   : > { %1903 = vmatpush1.bf16.msra.mxu1 %v2688_v0 }
 0x236   : > { %1904 = vmatprep.subr.bf16.mxu1 %v2693_v1 }
 0x239   : > { %1905 = vmatpush1.bf16.msra.mxu1 %v2691_v2 }
 0x23a   : > { %1906 = vmatprep.subr.bf16.mxu1 %v2696_v3 }
 0x23d   : > { %1907 = vmatpush1.bf16.msra.mxu1 %v2694_v4 }
 0x240   : > { %1925 = vmatmul.mubr.bf16.vlgmr.msra.gmra.mrb[12].mxu1 %v1548_v34 }
 0x313   : > { %v1926_v8 = vpop.f32.mrb[12].mxu1  ;;  %1946 = sbr.rel (!%p3193_p8) target bundleno = 822 (0x336), region = 56 }
 0x314   : > { %v2345_v9 = vadd.f32 %v1926_v8, %v1602_v6  ;;  %v1928_v10 = vpop.f32.mrb[13].mxu1 }
 0x315   : > { %v2346_v11 = vadd.f32 %v1928_v10, %v1606_v7  ;;  %v1930_v12 = vpop.f32.mrb[14].mxu1 }
 0x316   : > { %1935 = vst [vmem:[%s279_s8] sm:$0xff] %v2345_v9  ;;  %v2347_v13 = vadd.f32 %v1930_v12, %v1602_v6  ;;  %v1932_v14 = vpop.f32.mrb[15].mxu1 }
 0x317   : > { %1936 = vst [vmem:[%s279_s8 + $0x8] sm:$0xff] %v2346_v11  ;;  %v2348_v15 = vadd.f32 %v1932_v14, %v1606_v7 }
 0x318   : > { %1937 = vst [vmem:[%s279_s8 + $0x10] sm:$0xff] %v2347_v13 }
 0x319   : > { %1938 = vst [vmem:[%s279_s8 + $0x18] sm:$0xff] %v2348_v15 }
 0x31a   : > { %s3203_s12 = smov (!%p1949_p9, %s1948_s12), 2 }
 0x31b   : > { %s3115_s28 = sshll.u32 %s3203_s12, 8 }
 0x31c   : > { %s1954_s9 = ssub.s32 512, %s3115_s28 }
 0x31d   : > { %1955 = vsyncadd %s1940_s17, %s1954_s9  ;;  %p2265_p10 = scmp.ne.s32.totalorder %s3115_s28, 0  ;;  %s2274_s27 = sshll.u32 %s2917_s22, 9 }
 0x31e   : > { %s3125_s14 = scalar_lea.hbm %s3177_s5, %s2274_s27  ;;  %s1961_s15 = sshll.u32 %s279_s8, 4  ;;  %s3127_s15 = int_to_ptr.vmem [resolvable:$true] %s1961_s15 }
 0x31f   : > { %s2781_s16 = scalar_lea.vmem %s3127_s15, %s3115_s28  ;;  %s2863_s29 = smov [#allocation8]  }
 0x320   : > { %p2782_p1 = scmp.ne.s32.totalorder %s3127_s15, %s2781_s16  ;;  %s2785_s7 = sshll.u32 %s2863_s29, 4  ;;  %s2786_s7 = int_to_ptr.vmem [resolvable:$false] %s2785_s7 }
 0x321   : > { %s2787_s22 = scalar_lea.vmem %s2786_s7, 1024  ;;  %p2788_p5 = scmp.lt.s32.totalorder %s3127_s15, %s2786_s7 }
 0x322   : > { %p2783_p4 = pnand %p2782_p1, %p2265_p10  ;;  %p2789_p6 = scmp.lt.s32.totalorder %s2787_s22, %s2781_s16 }
 0x324   : > { %p2784_p3 = pneg %p2783_p4  ;;  %p2790_p11 = por %p2789_p6, %p2788_p5 }
 0x326   : > { %p2791_p13 = pnand %p2790_p11, %p2784_p3 }
 0x328   : > { %2794 = shalt.err (!%p2791_p13)
}
 0x329   : > { %s2795_s23 = scalar_lea.hbm %s3125_s14, %s3115_s28  ;;  %s2799_s8 = scalar_lea.hbm %s3177_s5, 1280 }
 0x32a   : > { %p2796_p12 = scmp.ne.s32.totalorder %s3125_s14, %s2795_s23  ;;  %p2800_p7 = scmp.lt.u32.totalorder %s3125_s14, %s3177_s5 }
 0x32b   : > { %p2801_p8 = scmp.lt.u32.totalorder %s2799_s8, %s2795_s23  ;;  %p2803_p1 = scmp.lt.u32.totalorder %s2795_s23, %s3125_s14 }
 0x32c   : > { %p2797_p0 = pnand %p2796_p12, %p2265_p10 }
 0x32d   : > { %p2802_p9 = por %p2801_p8, %p2800_p7 }
 0x32e   : > { %p2798_p2 = pneg %p2797_p0 }
 0x32f   : > { %p2804_p4 = por %p2803_p1, %p2802_p9 }
 0x331   : > { %p2805_p3 = pnand %p2804_p4, %p2798_p2 }
 0x333   : > { %2808 = shalt.err (!%p2805_p3)
}
 0x334   : > { %s2864_s9 = smov 256   ;;  %s2865_s27 = smov 16  }
 0x335   : > { %1967 = dma.vmem_to_hbm [thread:$0]  (%p2265_p10), %s3127_s15, %s3115_s28, %s3125_s14, %s1940_s17, %s2864_s9, %s2864_s9, %s2865_s27  }
 0x336 PF: > { %p2389_p5 = scmp.ge.s32.totalorder %s2851_s21, 2  ;;  %s1976_s30 = sand.u32 1, %s2839_s18  }
 0x337   : > { %p3194_p6 = scmp.ne.s32.totalorder %s3185_s6, 0  ;;  %s1977_s11 = scalar_lea.sflag [#allocation4], %s1976_s30 }
 0x339   : > { %p2382_p11 = pnand %p2389_p5, %p3194_p6 }
 0x33b   : > { %2834 = dma.done.wait (!%p2382_p11), %s1977_s11, 512  }
 0x33c   : > { %2836 = vsyncadd (!%p2382_p11), %s1977_s11, 4294966784  ;;  %s3195_s16 = sld [smem:[#allocation12_spill]]  ;;  %p19_p13 = scmp.ge.s32.totalorder %s2921_s24, 5  }
 0x33d   : > { %s3196_s18 = smov %s2843_s19  ;;  %s3197_s19 = smov %s2847_s20 }
 0x33e   : > { %s3199_s21 = smov %s2921_s24  ;;  %21 = sbr.rel (!%p19_p13) target bundleno = 6 (0x6), region = 93 }
 0x342   : > { %s3198_s20 = smov %s3195_s16 }
 0x345   :  { %1982 = vsyncpa [#allocation3], 1 }
 0x346   :  { %1984 = vsyncpa [#allocation3 + $0x1], 1 }
 0x347   :  { %1985 = vsyncpa [#allocation6], 1 }
 0x348   :  { %1986 = vsyncpa [#allocation4], 1 }
 0x349   :  { %1988 = vsyncpa [#allocation4 + $0x1], 1 }

</bundles_post_ra>
